<compile_context>
chip_gen: v7x
topology: tpu7x:2x2x1
jax: 0.10.0
libtpu: 0.0.40
codegen_flags: <defaults>
</compile_context>

<pallas_src>
import jax
import jax.numpy as jnp
from jax import lax
from jax.experimental import pallas as pl
from jax.experimental.pallas import tpu as pltpu


def _make_tv_kernel(tv_weight: float, H: int, W: int, TH: int):
    count_h = (H - 1) * W
    count_w = H * (W - 1)
    # Static reciprocals: divisions become compile-time constants.
    # NOTE: degenerate H==1 or W==1 gives 0*inf = NaN, matching torch's 0/0.
    inv_ch = (1.0 / count_h) if count_h > 0 else float("inf")
    inv_cw = (1.0 / count_w) if count_w > 0 else float("inf")
    scale = 2.0 * float(tv_weight)
    rem = H % TH  # valid rows in the last tile (0 => last tile is full)

    def tv_kernel(x_ref, out_ref, acc_h_ref, acc_w_ref, prev_row_ref):
        i = pl.program_id(0)
        nt = pl.num_programs(0)

        # Stream the tile in its storage dtype, upcast for compute.
        x = x_ref[...].astype(jnp.float32)          # (TH, W)
        first = x[0:1, :]                           # (1, W)

        @pl.when(i == 0)
        def _init():
            acc_h_ref[...] = jnp.zeros_like(acc_h_ref)
            acc_w_ref[...] = jnp.zeros_like(acc_w_ref)
            # Seed the halo with this tile's own first row so the i==0
            # boundary term (first - prev_row)^2 vanishes without any mask.
            prev_row_ref[...] = first

        prev_row = prev_row_ref[...]                # (1, W)
        bnd = first - prev_row
        bnd_sq = bnd * bnd                          # (1, W) cross-tile H-term

        def _interior():
            # Full tile: zero per-element masking in steady state.
            x_up = pltpu.roll(x, shift=1, axis=0)    # x_up[j]   = x[j-1] (row 0 wraps)
            x_left = pltpu.roll(x, shift=1, axis=1)  # x_left[:,c] = x[:,c-1] (col 0 wraps)
            dh = x - x_up
            dw = x - x_left
            last = x[TH - 1:TH, :]
            wrap = first - last                      # spurious row-0 wrap term
            h_cols = (jnp.sum(dh * dh, axis=0, keepdims=True)
                      - wrap * wrap + bnd_sq)
            w_cols = jnp.sum(dw * dw, axis=0, keepdims=True)
            acc_h_ref[...] = acc_h_ref[...] + h_cols
            acc_w_ref[...] = acc_w_ref[...] + w_cols
            prev_row_ref[...] = last                 # carry halo for next tile

        def _tail():
            # Last, partially filled tile only: padding rows may hold garbage,
            # so guard with a true select (runs on exactly one grid step).
            rows = lax.broadcasted_iota(jnp.int32, (TH, W), 0)
            valid = rows < rem
            x_up = pltpu.roll(x, shift=1, axis=0)
            x_left = pltpu.roll(x, shift=1, axis=1)
            dh = x - x_up
            dw = x - x_left
            h_sq = jnp.where(jnp.logical_and(rows >= 1, valid), dh * dh, 0.0)
            w_sq = jnp.where(valid, dw * dw, 0.0)
            h_cols = jnp.sum(h_sq, axis=0, keepdims=True) + bnd_sq
            w_cols = jnp.sum(w_sq, axis=0, keepdims=True)
            acc_h_ref[...] = acc_h_ref[...] + h_cols
            acc_w_ref[...] = acc_w_ref[...] + w_cols

        if rem == 0:
            _interior()                              # every tile is full
        else:
            @pl.when(i != nt - 1)
            def _():
                _interior()

            @pl.when(i == nt - 1)
            def _():
                _tail()

        @pl.when(i == nt - 1)
        def _finalize():
            # Drop the column-0 lane (lane-wrap terms) once, reduce across
            # lanes once, and apply scale / 1/count only here.
            col = lax.broadcasted_iota(jnp.int32, (1, W), 1)
            w_keep = jnp.where(col >= 1, acc_w_ref[...], 0.0)
            h_tot = jnp.sum(acc_h_ref[...], keepdims=True)   # (1, 1)
            w_tot = jnp.sum(w_keep, keepdims=True)           # (1, 1)
            out_ref[...] = jnp.float32(scale) * (
                h_tot * jnp.float32(inv_ch) + w_tot * jnp.float32(inv_cw))

    return tv_kernel


def _sublane_pack(itemsize: int) -> int:
    # Packed-sublane multiple: 8 for 4-byte, 16 for 2-byte, 32 for 1-byte.
    return 8 * max(1, 4 // max(itemsize, 1))


def _pick_row_tile(H: int, W: int, itemsize: int) -> int:
    pack = _sublane_pack(itemsize)
    # ~2 MiB f32-upcast tile: big enough to amortize the ~0.35us/step grid
    # overhead, small enough that the double-buffered input plus Mosaic
    # temporaries stay inside every generation's scoped VMEM (incl. v7x 64MiB).
    target_bytes = 2 * 1024 * 1024
    rows = target_bytes // max(W * 4, 1)
    rows = max(pack, min(1024, (rows // pack) * pack))
    return rows


def l_tv(x: jax.Array, tv_weight: float = 1.0, *, row_tile: int | None = None) -> jax.Array:
    """TV loss identical to the PyTorch L_TV.forward for a 2-D input [H, W]."""
    assert x.ndim == 2, "L_TV kernel expects a 2-D input [H, W]"
    H, W = x.shape
    pack = _sublane_pack(x.dtype.itemsize)

    if row_tile is None:
        row_tile = _pick_row_tile(H, W, x.dtype.itemsize)
    if row_tile >= H or H <= pack:
        TH = H                                            # single full-height block
    else:
        TH = max(pack, (min(row_tile, H) // pack) * pack)  # packed-sublane multiple
    num_tiles = pl.cdiv(H, TH)

    grid_spec = pltpu.PrefetchScalarGridSpec(
        num_scalar_prefetch=0,
        grid=(num_tiles,),
        in_specs=[pl.BlockSpec((TH, W), lambda i: (i, 0))],
        out_specs=pl.BlockSpec((1, 1), lambda i: (0, 0)),
        scratch_shapes=[
            pltpu.VMEM((1, W), jnp.float32),   # per-column h_tv accumulator
            pltpu.VMEM((1, W), jnp.float32),   # per-column w_tv accumulator
            pltpu.VMEM((1, W), jnp.float32),   # last row of previous tile (halo carry)
        ],
    )

    out = pl.pallas_call(
        _make_tv_kernel(tv_weight, H, W, TH),
        out_shape=jax.ShapeDtypeStruct((1, 1), jnp.float32),
        grid_spec=grid_spec,
        compiler_params=pltpu.CompilerParams(
            dimension_semantics=("arbitrary",),      # sequential halo carry / reduction
            vmem_limit_bytes=48 * 1024 * 1024,       # headroom on v5e, fits v7x's 64 MiB
        ),
        cost_estimate=pl.CostEstimate(
            flops=8 * H * W,
            transcendentals=0,
            bytes_accessed=H * W * x.dtype.itemsize + 4,
        ),
    )(x)
    return out[0, 0]


def _reference(x, tv_weight=1.0):
    # Pure-JAX reference mirroring the PyTorch code exactly (f32 math).
    x = x.astype(jnp.float32)
    H, W = x.shape
    count_h = (H - 1) * W
    count_w = H * (W - 1)
    h_tv = jnp.sum((x[1:, :] - x[:-1, :]) ** 2)
    w_tv = jnp.sum((x[:, 1:] - x[:, :-1]) ** 2)
    return tv_weight * 2.0 * (h_tv / count_h + w_tv / count_w)


if __name__ == "__main__":
    key = jax.random.PRNGKey(0)
    k1, k2, k3 = jax.random.split(key, 3)

    # Case 1: f32, multi-tile grid with a partial last row-tile
    # (exercises the mask-free interior path, the carried halo row, and the
    #  masked tail path for the padded final tile).
    x1 = jax.random.normal(k1, (40, 256), dtype=jnp.float32)
    out1 = jax.block_until_ready(l_tv(x1, tv_weight=1.0, row_tile=16))
    ref1 = _reference(x1, 1.0)
    assert jnp.allclose(out1, ref1, rtol=1e-4, atol=1e-4), (out1, ref1)

    # Case 2: bf16 input streamed as bf16 (TH rounded to 16-row packing) and
    # upcast inside the kernel; all tiles full.
    x2 = jax.random.normal(k2, (64, 128), dtype=jnp.bfloat16)
    out2 = jax.block_until_ready(l_tv(x2, tv_weight=0.5, row_tile=32))
    ref2 = _reference(x2, 0.5)
    assert jnp.allclose(out2, ref2, rtol=1e-4, atol=1e-4), (out2, ref2)

    # Case 3: default tiling, odd H handled as a single full-height block.
    x3 = jax.random.normal(k3, (33, 384), dtype=jnp.float32)
    out3 = jax.block_until_ready(l_tv(x3, tv_weight=2.0))
    ref3 = _reference(x3, 2.0)
    assert jnp.allclose(out3, ref3, rtol=1e-4, atol=1e-4), (out3, ref3)

    print("KERNEL_OK")
</pallas_src>

<mosaic_0001>
module attributes {stable_mosaic.version = 11 : i64} {
  func.func @tv_kernel(%arg0: i32, %arg1: memref<16x256xf32, #tpu.memory_space<vmem>>, %arg2: memref<1x1xf32, #tpu.memory_space<vmem>>, %arg3: memref<1x256xf32, #tpu.memory_space<vmem>>, %arg4: memref<1x256xf32, #tpu.memory_space<vmem>>, %arg5: memref<1x256xf32, #tpu.memory_space<vmem>>) attributes {dimension_semantics = [#tpu.dimension_semantics<arbitrary>], iteration_bounds = array<i64: 3>, scalar_prefetch = 0 : i64, scratch_operands = 3 : i64, tpu.core_type = #tpu.core_type<tc>, window_params = [{transform_indices = @transform_0, window_bounds = array<i64: 16, 256>}, {pipeline_mode = #tpu.pipeline_mode<synchronous>, transform_indices = @transform_1, window_bounds = array<i64: 1, 1>}]} {
    %c0 = arith.constant 0 : index
    %c0_0 = arith.constant 0 : index
    %0 = vector.load %arg1[%c0, %c0_0] : memref<16x256xf32, #tpu.memory_space<vmem>>, vector<16x256xf32>
    %1 = vector.extract_strided_slice %0 {offsets = [0, 0], sizes = [1, 256], strides = [1, 1]} : vector<16x256xf32> to vector<1x256xf32>
    %c0_i32 = arith.constant 0 : i32
    %2 = arith.cmpi eq, %arg0, %c0_i32 : i32
    %3 = arith.extui %2 : i1 to i32
    %c0_i32_1 = arith.constant 0 : i32
    %4 = arith.cmpi ne, %3, %c0_i32_1 : i32
    scf.if %4 {
      %cst = arith.constant 0.000000e+00 : f32
      %17 = vector.broadcast %cst : f32 to vector<1x256xf32>
      %c0_9 = arith.constant 0 : index
      %c0_10 = arith.constant 0 : index
      %18 = vector.load %arg3[%c0_9, %c0_10] : memref<1x256xf32, #tpu.memory_space<vmem>>, vector<1x256xf32>
      tpu.vector_store %arg3[%c0_9, %c0_10], %17 {strides = array<i32>} : memref<1x256xf32, #tpu.memory_space<vmem>>, vector<1x256xf32>,
      %cst_11 = arith.constant 0.000000e+00 : f32
      %19 = vector.broadcast %cst_11 : f32 to vector<1x256xf32>
      %c0_12 = arith.constant 0 : index
      %c0_13 = arith.constant 0 : index
      %20 = vector.load %arg4[%c0_12, %c0_13] : memref<1x256xf32, #tpu.memory_space<vmem>>, vector<1x256xf32>
      tpu.vector_store %arg4[%c0_12, %c0_13], %19 {strides = array<i32>} : memref<1x256xf32, #tpu.memory_space<vmem>>, vector<1x256xf32>,
      %c0_14 = arith.constant 0 : index
      %c0_15 = arith.constant 0 : index
      %21 = vector.load %arg5[%c0_14, %c0_15] : memref<1x256xf32, #tpu.memory_space<vmem>>, vector<1x256xf32>
      tpu.vector_store %arg5[%c0_14, %c0_15], %1 {strides = array<i32>} : memref<1x256xf32, #tpu.memory_space<vmem>>, vector<1x256xf32>,
    } else {
    }
    %c0_2 = arith.constant 0 : index
    %c0_3 = arith.constant 0 : index
    %5 = vector.load %arg5[%c0_2, %c0_3] : memref<1x256xf32, #tpu.memory_space<vmem>>, vector<1x256xf32>
    %6 = arith.subf %1, %5 : vector<1x256xf32>
    %7 = arith.mulf %6, %6 : vector<1x256xf32>
    %c2_i32 = arith.constant 2 : i32
    %8 = arith.cmpi ne, %arg0, %c2_i32 : i32
    %9 = arith.extui %8 : i1 to i32
    %c0_i32_4 = arith.constant 0 : i32
    %10 = arith.cmpi ne, %9, %c0_i32_4 : i32
    scf.if %10 {
      %c1_i32 = arith.constant 1 : i32
      %17 = tpu.dynamic_rotate %0 by %c1_i32 dim 0 : vector<16x256xf32>, i32 -> vector<16x256xf32>
      %c1_i32_9 = arith.constant 1 : i32
      %18 = tpu.dynamic_rotate %0 by %c1_i32_9 dim 1 : vector<16x256xf32>, i32 -> vector<16x256xf32>
      %19 = arith.subf %0, %17 : vector<16x256xf32>
      %20 = arith.subf %0, %18 : vector<16x256xf32>
      %21 = vector.extract_strided_slice %0 {offsets = [15, 0], sizes = [1, 256], strides = [1, 1]} : vector<16x256xf32> to vector<1x256xf32>
      %22 = arith.subf %1, %21 : vector<1x256xf32>
      %23 = arith.mulf %19, %19 : vector<16x256xf32>
      %cst = arith.constant dense<0.000000e+00> : vector<256xf32>
      %24 = vector.multi_reduction <add>, %23, %cst [0] : vector<16x256xf32> to vector<256xf32>
      %25 = vector.shape_cast %24 : vector<256xf32> to vector<1x256xf32>
      %26 = arith.mulf %22, %22 : vector<1x256xf32>
      %27 = arith.subf %25, %26 : vector<1x256xf32>
      %28 = arith.addf %27, %7 : vector<1x256xf32>
      %29 = arith.mulf %20, %20 : vector<16x256xf32>
      %cst_10 = arith.constant dense<0.000000e+00> : vector<256xf32>
      %30 = vector.multi_reduction <add>, %29, %cst_10 [0] : vector<16x256xf32> to vector<256xf32>
      %31 = vector.shape_cast %30 : vector<256xf32> to vector<1x256xf32>
      %c0_11 = arith.constant 0 : index
      %c0_12 = arith.constant 0 : index
      %32 = vector.load %arg3[%c0_11, %c0_12] : memref<1x256xf32, #tpu.memory_space<vmem>>, vector<1x256xf32>
      %33 = arith.addf %32, %28 : vector<1x256xf32>
      %c0_13 = arith.constant 0 : index
      %c0_14 = arith.constant 0 : index
      %34 = vector.load %arg3[%c0_13, %c0_14] : memref<1x256xf32, #tpu.memory_space<vmem>>, vector<1x256xf32>
      tpu.vector_store %arg3[%c0_13, %c0_14], %33 {strides = array<i32>} : memref<1x256xf32, #tpu.memory_space<vmem>>, vector<1x256xf32>,
      %c0_15 = arith.constant 0 : index
      %c0_16 = arith.constant 0 : index
      %35 = vector.load %arg4[%c0_15, %c0_16] : memref<1x256xf32, #tpu.memory_space<vmem>>, vector<1x256xf32>
      %36 = arith.addf %35, %31 : vector<1x256xf32>
      %c0_17 = arith.constant 0 : index
      %c0_18 = arith.constant 0 : index
      %37 = vector.load %arg4[%c0_17, %c0_18] : memref<1x256xf32, #tpu.memory_space<vmem>>, vector<1x256xf32>
      tpu.vector_store %arg4[%c0_17, %c0_18], %36 {strides = array<i32>} : memref<1x256xf32, #tpu.memory_space<vmem>>, vector<1x256xf32>,
      %c0_19 = arith.constant 0 : index
      %c0_20 = arith.constant 0 : index
      %38 = vector.load %arg5[%c0_19, %c0_20] : memref<1x256xf32, #tpu.memory_space<vmem>>, vector<1x256xf32>
      tpu.vector_store %arg5[%c0_19, %c0_20], %21 {strides = array<i32>} : memref<1x256xf32, #tpu.memory_space<vmem>>, vector<1x256xf32>,
    } else {
    }
    %c2_i32_5 = arith.constant 2 : i32
    %11 = arith.cmpi eq, %arg0, %c2_i32_5 : i32
    %12 = arith.extui %11 : i1 to i32
    %c0_i32_6 = arith.constant 0 : i32
    %13 = arith.cmpi ne, %12, %c0_i32_6 : i32
    scf.if %13 {
      %17 = tpu.iota {dimensions = array<i32: 0>} : vector<16x256xi32>
      %c8_i32 = arith.constant 8 : i32
      %18 = vector.broadcast %c8_i32 : i32 to vector<16x256xi32>
      %19 = arith.cmpi slt, %17, %18 : vector<16x256xi32>
      %c1_i32 = arith.constant 1 : i32
      %20 = tpu.dynamic_rotate %0 by %c1_i32 dim 0 : vector<16x256xf32>, i32 -> vector<16x256xf32>
      %c1_i32_9 = arith.constant 1 : i32
      %21 = tpu.dynamic_rotate %0 by %c1_i32_9 dim 1 : vector<16x256xf32>, i32 -> vector<16x256xf32>
      %22 = arith.subf %0, %20 : vector<16x256xf32>
      %23 = arith.subf %0, %21 : vector<16x256xf32>
      %c1_i32_10 = arith.constant 1 : i32
      %24 = vector.broadcast %c1_i32_10 : i32 to vector<16x256xi32>
      %25 = arith.cmpi sge, %17, %24 : vector<16x256xi32>
      %26 = arith.andi %25, %19 : vector<16x256xi1>
      %27 = arith.mulf %22, %22 : vector<16x256xf32>
      %cst = arith.constant 0.000000e+00 : f32
      %28 = vector.broadcast %cst : f32 to vector<16x256xf32>
      %29 = arith.select %26, %27, %28 : vector<16x256xi1>, vector<16x256xf32>
      %30 = arith.mulf %23, %23 : vector<16x256xf32>
      %cst_11 = arith.constant 0.000000e+00 : f32
      %31 = vector.broadcast %cst_11 : f32 to vector<16x256xf32>
      %32 = arith.select %19, %30, %31 : vector<16x256xi1>, vector<16x256xf32>
      %cst_12 = arith.constant dense<0.000000e+00> : vector<256xf32>
      %33 = vector.multi_reduction <add>, %29, %cst_12 [0] : vector<16x256xf32> to vector<256xf32>
      %34 = vector.shape_cast %33 : vector<256xf32> to vector<1x256xf32>
      %35 = arith.addf %34, %7 : vector<1x256xf32>
      %cst_13 = arith.constant dense<0.000000e+00> : vector<256xf32>
      %36 = vector.multi_reduction <add>, %32, %cst_13 [0] : vector<16x256xf32> to vector<256xf32>
      %37 = vector.shape_cast %36 : vector<256xf32> to vector<1x256xf32>
      %c0_14 = arith.constant 0 : index
      %c0_15 = arith.constant 0 : index
      %38 = vector.load %arg3[%c0_14, %c0_15] : memref<1x256xf32, #tpu.memory_space<vmem>>, vector<1x256xf32>
      %39 = arith.addf %38, %35 : vector<1x256xf32>
      %c0_16 = arith.constant 0 : index
      %c0_17 = arith.constant 0 : index
      %40 = vector.load %arg3[%c0_16, %c0_17] : memref<1x256xf32, #tpu.memory_space<vmem>>, vector<1x256xf32>
      tpu.vector_store %arg3[%c0_16, %c0_17], %39 {strides = array<i32>} : memref<1x256xf32, #tpu.memory_space<vmem>>, vector<1x256xf32>,
      %c0_18 = arith.constant 0 : index
      %c0_19 = arith.constant 0 : index
      %41 = vector.load %arg4[%c0_18, %c0_19] : memref<1x256xf32, #tpu.memory_space<vmem>>, vector<1x256xf32>
      %42 = arith.addf %41, %37 : vector<1x256xf32>
      %c0_20 = arith.constant 0 : index
      %c0_21 = arith.constant 0 : index
      %43 = vector.load %arg4[%c0_20, %c0_21] : memref<1x256xf32, #tpu.memory_space<vmem>>, vector<1x256xf32>
      tpu.vector_store %arg4[%c0_20, %c0_21], %42 {strides = array<i32>} : memref<1x256xf32, #tpu.memory_space<vmem>>, vector<1x256xf32>,
    } else {
    }
    %c2_i32_7 = arith.constant 2 : i32
    %14 = arith.cmpi eq, %arg0, %c2_i32_7 : i32
    %15 = arith.extui %14 : i1 to i32
    %c0_i32_8 = arith.constant 0 : i32
    %16 = arith.cmpi ne, %15, %c0_i32_8 : i32
    scf.if %16 {
      %17 = tpu.iota {dimensions = array<i32: 1>} : vector<1x256xi32>
      %c1_i32 = arith.constant 1 : i32
      %18 = vector.broadcast %c1_i32 : i32 to vector<1x256xi32>
      %19 = arith.cmpi sge, %17, %18 : vector<1x256xi32>
      %c0_9 = arith.constant 0 : index
      %c0_10 = arith.constant 0 : index
      %20 = vector.load %arg4[%c0_9, %c0_10] : memref<1x256xf32, #tpu.memory_space<vmem>>, vector<1x256xf32>
      %cst = arith.constant 0.000000e+00 : f32
      %21 = vector.broadcast %cst : f32 to vector<1x256xf32>
      %22 = arith.select %19, %20, %21 : vector<1x256xi1>, vector<1x256xf32>
      %c0_11 = arith.constant 0 : index
      %c0_12 = arith.constant 0 : index
      %23 = vector.load %arg3[%c0_11, %c0_12] : memref<1x256xf32, #tpu.memory_space<vmem>>, vector<1x256xf32>
      %24 = vector.shape_cast %23 : vector<1x256xf32> to vector<1x1x256xf32>
      %cst_13 = arith.constant dense<0.000000e+00> : vector<1xf32>
      %25 = vector.multi_reduction <add>, %24, %cst_13 [1, 2] : vector<1x1x256xf32> to vector<1xf32>
      %26 = vector.shape_cast %25 : vector<1xf32> to vector<1x1x1xf32>
      %27 = vector.extract %26[0, 0, 0] : f32 from vector<1x1x1xf32>
      %28 = vector.broadcast %27 : f32 to vector<1x1xf32>
      %29 = vector.shape_cast %22 : vector<1x256xf32> to vector<1x1x256xf32>
      %cst_14 = arith.constant dense<0.000000e+00> : vector<1xf32>
      %30 = vector.multi_reduction <add>, %29, %cst_14 [1, 2] : vector<1x1x256xf32> to vector<1xf32>
      %31 = vector.shape_cast %30 : vector<1xf32> to vector<1x1x1xf32>
      %32 = vector.extract %31[0, 0, 0] : f32 from vector<1x1x1xf32>
      %33 = vector.broadcast %32 : f32 to vector<1x1xf32>
      %cst_15 = arith.constant 1.00160258E-4 : f32
      %34 = vector.broadcast %cst_15 : f32 to vector<1x1xf32>
      %35 = arith.mulf %28, %34 : vector<1x1xf32>
      %cst_16 = arith.constant 9.80392142E-5 : f32
      %36 = vector.broadcast %cst_16 : f32 to vector<1x1xf32>
      %37 = arith.mulf %33, %36 : vector<1x1xf32>
      %38 = arith.addf %35, %37 : vector<1x1xf32>
      %cst_17 = arith.constant 2.000000e+00 : f32
      %39 = vector.broadcast %cst_17 : f32 to vector<1x1xf32>
      %40 = arith.mulf %39, %38 : vector<1x1xf32>
      %c0_18 = arith.constant 0 : index
      %c0_19 = arith.constant 0 : index
      %41 = vector.load %arg2[%c0_18, %c0_19] : memref<1x1xf32, #tpu.memory_space<vmem>>, vector<1x1xf32>
      tpu.vector_store %arg2[%c0_18, %c0_19], %40 {strides = array<i32>} : memref<1x1xf32, #tpu.memory_space<vmem>>, vector<1x1xf32>,
    } else {
    }
    return
  }
  func.func @transform_0(%arg0: i32) -> (i32, i32) {
    %c0_i32 = arith.constant 0 : i32
    %c0_i32_0 = arith.constant 0 : i32
    return %arg0, %c0_i32 : i32, i32
  }
  func.func @transform_1(%arg0: i32) -> (i32, i32) {
    %c0_i32 = arith.constant 0 : i32
    %c0_i32_0 = arith.constant 0 : i32
    %c0_i32_1 = arith.constant 0 : i32
    return %c0_i32, %c0_i32_0 : i32, i32
  }
}

</mosaic_0001>

<bundles_post_ra>
// kernel: tpu_custom_call.1
= control target key start
LH: loop header
LB: loop body
LE: loop exit
PB: predicated region body
PF: predicated region fallthrough
CT: control target
= control target key end

     0   :  { %6 = vsyncpa [#allocation6], 0  ;;  %s1018_s0 = inlined_call_operand.hbm [shape: f32[40,256], index: 0, kind: input, shape index: {}]   ;;  %s1019_s1 = inlined_call_operand.hbm [shape: f32[1,1], index: 1, kind: output, shape index: {}]  }
   0x1   :  { %8 = vsyncpa [#allocation6 + $0x1], 0 }
   0x2   :  { %9 = vsyncpa [#allocation7], 0  ;;  %s785_s6 = smov 0   ;;  %s787_s7 = smov 0  }
   0x3   :  { %s789_s8 = smov 0   ;;  %s791_s9 = smov 0  }
   0x4 LB: > { %s804_s10 = sadd.s32 4294967295, %s763_s9   ;;  %s807_s11 = sadd.s32 1, %s763_s9   ;;  %s763_s9 = sphi %s791_s9, %s1028_s9   ;;  %s759_s8 = sphi %s789_s8, %s1027_s8   ;;  %s755_s7 = sphi %s787_s7, %s1026_s7   ;;  %s751_s6 = sphi %s785_s6, %s1025_s6  }
   0x5   : > { %s19_s12 = ssub.s32 %s763_s9, %s807_s11  ;;  %s22_s13 = sadd.s32 1, %s759_s8 }
   0x6   : > { %p20_p0 = scmp.eq.s32.totalorder %s19_s12, 0  ;;  %p29_p1 = scmp.ne.s32.totalorder %s759_s8, %s755_s7 }
   0x7   : > { %p30_p2 = scmp.eq.s32.totalorder %s763_s9, 0  ;;  %p35_p3 = scmp.ne.s32.totalorder %s755_s7, %s751_s6 }
   0x8   : > { %s817_s14 = scalar_select %p20_p0, %s759_s8, %s22_s13  }
   0x9   : > { %p31_p4 = por %p30_p2, %p29_p1  ;;  %p36_p5 = scmp.eq.s32.totalorder %s804_s10, 0 }
   0xa   : > { %p597_p7 = scmp.ge.s32.totalorder %s763_s9, 3 }
   0xb   : > { %p820_p6 = por %p36_p5, %p35_p3 }
   0xc   : > { %76 = sbr.rel (%p597_p7) target bundleno = 54 (0x36), region = 16 }
  0x13   : > { %79 = sbr.rel (!%p31_p4) target bundleno = 54 (0x36), region = 20  ;;  %s80_s16 = sand.u32 (%p31_p4), 1, %s759_s8  }
  0x14   : > { %s599_s17 = sshll.u32 (%p31_p4), %s763_s9, 1  ;;  %s598_s18 = sshll.u32 (%p31_p4), %s80_s16, 5 }
  0x15   : > { %s86_s19 = ssub.s32 (%p31_p4), 5, %s599_s17  ;;  %s830_s22 = scalar_lea.sflag (%p31_p4), [#allocation6], %s80_s16 }
  0x16   : > { %p87_p8 = scmp.lt.s32.totalorder (%p31_p4), %s86_s19, 2  ;;  %s84_s23 = scalar_lea.vmem (%p31_p4), [#allocation5], %s598_s18 }
  0x1a   : > { %s1030_s19 = smov (!%p87_p8, %s86_s19), 2 }
  0x1b   : > { %s827_s20 = sshll.u32 %s1030_s19, 8 }
  0x1c   : > { %s92_s21 = ssub.s32 512, %s827_s20 }
  0x1d   : > { %93 = vsyncadd %s830_s22, %s92_s21  ;;  %p602_p9 = scmp.ne.s32.totalorder %s827_s20, 0  ;;  %s618_s24 = sshll.u32 %s763_s9, 9 }
  0x1e   : > { %s838_s27 = scalar_lea.hbm %s1018_s0, %s618_s24  ;;  %s99_s28 = sshll.u32 %s84_s23, 4  ;;  %s840_s28 = int_to_ptr.vmem [resolvable:$true] %s99_s28 }
  0x1f   : > { %s671_s29 = scalar_lea.hbm %s838_s27, %s827_s20  ;;  %s675_s3 = scalar_lea.hbm %s1018_s0, 1280 }
  0x20   : > { %p672_p10 = scmp.ne.s32.totalorder %s838_s27, %s671_s29  ;;  %p676_p13 = scmp.lt.u32.totalorder %s838_s27, %s1018_s0 }
  0x21   : > { %p677_p0 = scmp.lt.u32.totalorder %s675_s3, %s671_s29  ;;  %p679_p2 = scmp.lt.u32.totalorder %s671_s29, %s838_s27 }
  0x22   : > { %p673_p11 = pnand %p672_p10, %p602_p9 }
  0x23   : > { %p678_p1 = por %p677_p0, %p676_p13 }
  0x24   : > { %p674_p12 = pneg %p673_p11 }
  0x25   : > { %p680_p3 = por %p679_p2, %p678_p1 }
  0x27   : > { %p681_p4 = pnand %p680_p3, %p674_p12 }
  0x29   : > { %684 = shalt.err (!%p681_p4)
}
  0x2a   : > { %s685_s6 = scalar_lea.vmem %s840_s28, %s827_s20  ;;  %s765_s12 = smov [#allocation5]  }
  0x2b   : > { %p686_p5 = scmp.ne.s32.totalorder %s840_s28, %s685_s6  ;;  %s689_s13 = sshll.u32 %s765_s12, 4  ;;  %s690_s13 = int_to_ptr.vmem [resolvable:$false] %s689_s13 }
  0x2c   : > { %s691_s16 = scalar_lea.vmem %s690_s13, 1024  ;;  %p692_p10 = scmp.lt.s32.totalorder %s840_s28, %s690_s13 }
  0x2d   : > { %p687_p7 = pnand %p686_p5, %p602_p9  ;;  %p693_p11 = scmp.lt.s32.totalorder %s691_s16, %s685_s6 }
  0x2f   : > { %p688_p8 = pneg %p687_p7  ;;  %p694_p13 = por %p693_p11, %p692_p10 }
  0x31   : > { %p695_p0 = pnand %p694_p13, %p688_p8 }
  0x33   : > { %698 = shalt.err (!%p695_p0)
}
  0x34   : > { %s766_s17 = smov 256   ;;  %s767_s18 = smov 16  }
  0x35   : > { %105 = dma.hbm_to_vmem [thread:$0]  (%p602_p9), %s838_s27, %s827_s20, %s840_s28, %s830_s22, %s766_s17, %s766_s17, %s767_s18  }
  0x36 PF: > { %p607_p12 = scmp.ge.s32.totalorder %s763_s9, 1  ;;  %p107_p1 = scmp.lt.s32.totalorder %s763_s9, 4 }
  0x38   : > { %p108_p2 = pnand %p607_p12, %p107_p1 }
  0x39   : > { %s113_s19 = sand.u32 (!%p108_p2), 1, %s755_s7  }
  0x3a   : > { %111 = sbr.rel (%p108_p2) target bundleno = 625 (0x271), region = 24  ;;  %s608_s21 = sshll.u32 (!%p108_p2), %s113_s19, 5 }
  0x3b   : > { %s114_s23 = scalar_lea.sflag (!%p108_p2), [#allocation6], %s113_s19  ;;  %s117_s24 = scalar_lea.vmem (!%p108_p2), [#allocation5], %s608_s21 }
  0x41   : > { %742 = dma.done.wait (%p820_p6), %s114_s23, 512  }
  0x42   : > { %744 = vsyncadd (%p820_p6), %s114_s23, 4294966784  ;;  %v874_v0 = vld [vmem:[%s117_s24] sm:$0xff]  ;;  %v876_v1 = vld [vmem:[%s117_s24 + $0x8] sm:$0xff]  ;;  %p609_p9 = scmp.ne.s32.totalorder %s804_s10, 0 }
  0x43   : > { %v878_v2 = vld [vmem:[%s117_s24 + $0x10] sm:$0xff]  ;;  %v880_v3 = vld [vmem:[%s117_s24 + $0x18] sm:$0xff]  ;;  %v145_v4 = vlaneseq (!%p609_p9)  ;;  %v768_v5 = vmov (!%p609_p9), 1966171168   ;;  %v769_v8 = vmov (!%p609_p9), 0.0   ;;  %v153_v9 = vcombine.low (!%p609_p9), %v874_v0, %v876_v1 }
  0x44   : > { %144 = sbr.rel (%p609_p9) target bundleno = 79 (0x4f), region = 32  ;;  %v155_v6 = vunpack.c.l.s4 (!%p609_p9), %v768_v5 }
  0x45   : > { %vm147_vm0 = vcmp.lt.s32.totalorder (!%p609_p9), %v145_v4, 256  ;;  %v158_v7 = vshrl.u32 (!%p609_p9), %v145_v4, 7 }
  0x46   : > { %149 = vst.msk [vmem:[#allocation2] sm:$0x3] (!%p609_p9), %vm147_vm0, %v769_v8  ;;  %150 = vst.msk [vmem:[#allocation3] sm:$0x3] (!%p609_p9), %vm147_vm0, %v769_v8  ;;  %v156_v10 = vunpack.c.0.s8 (!%p609_p9), %v155_v6 }
  0x48   : > { %v159_v11 = vsub.s32 (!%p609_p9), %v156_v10, %v158_v7 }
  0x4a   : > { %v160_v12 = vrot.slane (!%p609_p9), %v153_v9, %v159_v11 }
  0x4c   : > { %v167_v13 = vrot.slane %v160_v12, %v159_v11 }
  0x4e   : > { %169 = vst.msk [vmem:[#allocation4] sm:$0x3] %vm147_vm0, %v167_v13 }
  0x4f PF: > { %v172_v14 = vlaneseq  ;;  %p610_p6 = scmp.eq.s32.totalorder %s804_s10, 2 }
  0x50   : > { %s770_s9 = smov (!%p610_p6), 1   ;;  %v771_v25 = vmov (!%p610_p6), 1966171168   ;;  %v190_v27 = vrot.slane (!%p610_p6), %v874_v0, 7  ;;  %v191_v28 = vrot.slane (!%p610_p6), %v876_v1, 7  ;;  %v192_v29 = vrot.slane (!%p610_p6), %v878_v2, 7 }
  0x51   : > { %v886_v15 = vshrl.u32 %v172_v14, 7  ;;  %205 = vrot.lane.b32.xlu1 (!%p610_p6), %v876_v1, %s770_s9  ;;  %201 = vrot.lane.b32.xlu0 (!%p610_p6), %v874_v0, %s770_s9  ;;  %v279_v26 = vunpack.c.l.s4 (!%p610_p6), %v771_v25  ;;  %v193_v30 = vrot.slane (!%p610_p6), %v880_v3, 7  ;;  %v320_v32 = vcombine.high (!%p610_p6), %v878_v2, %v880_v3 }
  0x52   : > { %vm926_vm2 = vcmp.lt.s32.totalorder (!%p610_p6), %v172_v14, 256  ;;  %v230_v57 = vsub.f32 (!%p610_p6), %v874_v0, %v192_v29 }
  0x53   : > { %v889_v17 = vsub.s32 0, %v886_v15  ;;  %v892_v18 = vsub.s32 1, %v886_v15  ;;  %vm196_vm1 = vcmp.lt.s32.totalorder (!%p610_p6), %v886_v15, 1  ;;  %v280_v31 = vunpack.c.0.s8 (!%p610_p6), %v279_v26 }
  0x54   : > { %189 = sbr.rel (%p610_p6) target bundleno = 228 (0xe4), region = 36  ;;  %v197_v33 = vsel (!%p610_p6), %vm196_vm1, %v190_v27, %v192_v29  ;;  %v198_v34 = vsel (!%p610_p6), %vm196_vm1, %v191_v28, %v193_v30  ;;  %v199_v35 = vsel (!%p610_p6), %vm196_vm1, %v192_v29, %v190_v27  ;;  %v200_v36 = vsel (!%p610_p6), %vm196_vm1, %v193_v30, %v191_v28 }
  0x55   : > { %v170_v16 = vld [vmem:[#allocation4] sm:$0x3]  ;;  %207 = vrot.lane.b32.xlu1 (!%p610_p6), %v880_v3, %s770_s9  ;;  %203 = vrot.lane.b32.xlu0 (!%p610_p6), %v878_v2, %s770_s9  ;;  %v917_v37 = vsub.s32 (!%p610_p6), %v280_v31, %v886_v15  ;;  %v216_v38 = vsub.f32 (!%p610_p6), %v874_v0, %v199_v35  ;;  %v217_v39 = vsub.f32 (!%p610_p6), %v876_v1, %v200_v36 }
  0x56   : > { %v175_v19 = vrot.slane %v170_v16, %v889_v17  ;;  %v179_v20 = vrot.slane %v170_v16, %v892_v18  ;;  %v218_v40 = vsub.f32 (!%p610_p6), %v878_v2, %v197_v33  ;;  %v219_v41 = vsub.f32 (!%p610_p6), %v880_v3, %v198_v34 }
  0x57   : > { %v327_v42 = vrot.slane (!%p610_p6), %v320_v32, %v917_v37  ;;  %v232_v43 = vmul.f32 (!%p610_p6), %v216_v38, %v216_v38  ;;  %v233_v44 = vmul.f32 (!%p610_p6), %v217_v39, %v217_v39  ;;  %v231_v58 = vsub.f32 (!%p610_p6), %v876_v1, %v193_v30 }
  0x58   : > { %v182_v21 = vsub.f32 %v874_v0, %v175_v19  ;;  %v183_v22 = vsub.f32 %v876_v1, %v179_v20  ;;  %v234_v45 = vmul.f32 (!%p610_p6), %v218_v40, %v218_v40  ;;  %v235_v46 = vmul.f32 (!%p610_p6), %v219_v41, %v219_v41  ;;  %v274_v19 = vld [vmem:[#allocation2] sm:$0x3] (!%p610_p6) }
  0x59   : > { %v328_v47 = vcombine.high (!%p610_p6), %v327_v42, %v327_v42  ;;  %v250_v5 = vmul.f32 (!%p610_p6), %v230_v57, %v230_v57  ;;  %v251_v6 = vmul.f32 (!%p610_p6), %v231_v58, %v231_v58 }
  0x5a   : > { %v898_v23 = vmul.f32 %v182_v21, %v182_v21  ;;  %v900_v24 = vmul.f32 %v183_v22, %v183_v22  ;;  %v236_v48 = vadd.f32 (!%p610_p6), %v234_v45, %v232_v43  ;;  %v243_v49 = vadd.f32 (!%p610_p6), %v235_v46, %v233_v44 }
  0x5b   : > { %v335_v50 = vrot.slane %v328_v47, %v917_v37  ;;  %v210_v22 = vand.u32 127, %v172_v14 }
  0x5c   : > { %v237_v52 = vrot.slane %v236_v48, 4  ;;  %v244_v53 = vrot.slane %v243_v49, 4 }
  0x5d   : > { %v336_v54 = vcombine.high %v335_v50, %v335_v50  ;;  %vm211_vm3 = vcmp.lt.s32.totalorder %v210_v22, 1 }
  0x5e   : > { %v238_v55 = vadd.f32 %v237_v52, %v236_v48  ;;  %v245_v56 = vadd.f32 %v244_v53, %v243_v49 }
  0x5f   : > { %338 = vst.msk [vmem:[#allocation4] sm:$0x3] %vm926_vm2, %v336_v54 }
  0x60   : > { %v239_v59 = vrot.slane %v238_v55, 2  ;;  %v246_v60 = vrot.slane %v245_v56, 2 }
  0x62   : > { %v240_v61 = vadd.f32 %v239_v59, %v238_v55  ;;  %v247_v62 = vadd.f32 %v246_v60, %v245_v56  ;;  %v299_v59 = vld [vmem:[#allocation3] sm:$0x3] }
  0x64   : > { %v241_v63 = vrot.slane %v240_v61, 1  ;;  %v248_v4 = vrot.slane %v247_v62, 1 }
  0x66   : > { %v242_v7 = vadd.f32 %v241_v63, %v240_v61  ;;  %v249_v8 = vadd.f32 %v248_v4, %v247_v62 }
  0x68   : > { %v252_v9 = vsub.f32 %v242_v7, %v250_v5  ;;  %v253_v10 = vsub.f32 %v249_v8, %v251_v6 }
  0x6a   : > { %v254_v11 = vadd.f32 %v252_v9, %v898_v23  ;;  %v255_v12 = vadd.f32 %v253_v10, %v900_v24 }
  0x6c   : > { %v277_v13 = vcombine.low %v254_v11, %v255_v12 }
  0x6e   : > { %v284_v16 = vrot.slane %v277_v13, %v917_v37 }
  0x70   : > { %v291_v20 = vrot.slane %v284_v16, %v917_v37 }
  0x72   : > { %v293_v21 = vadd.f32 %v291_v20, %v274_v19 }
  0x74   : > { %298 = vst.msk [vmem:[#allocation2] sm:$0x3] %vm926_vm2, %v293_v21 }
  0xc3   : > { %v206_v25 = vpop.permute.xlu1 %205  ;;  %v202_v26 = vpop.permute.xlu0 %201 }
  0xc4   : > { %v212_v27 = vsel %vm211_vm3, %v202_v26, %v206_v25  ;;  %v214_v28 = vsel %vm211_vm3, %v206_v25, %v202_v26 }
  0xc5   : > { %v220_v29 = vsub.f32 %v874_v0, %v214_v28  ;;  %v221_v30 = vsub.f32 %v876_v1, %v212_v27 }
  0xc7   : > { %v208_v31 = vpop.permute.xlu1 %207  ;;  %v204_v32 = vpop.permute.xlu0 %203  ;;  %v256_v38 = vmul.f32 %v220_v29, %v220_v29  ;;  %v257_v39 = vmul.f32 %v221_v30, %v221_v30 }
  0xc8   : > { %v213_v33 = vsel %vm211_vm3, %v204_v32, %v208_v31  ;;  %v215_v34 = vsel %vm211_vm3, %v208_v31, %v204_v32 }
  0xc9   : > { %v222_v35 = vsub.f32 %v878_v2, %v215_v34  ;;  %v223_v36 = vsub.f32 %v880_v3, %v213_v33 }
  0xcb   : > { %v258_v40 = vmul.f32 %v222_v35, %v222_v35  ;;  %v259_v41 = vmul.f32 %v223_v36, %v223_v36 }
  0xcd   : > { %v260_v42 = vadd.f32 %v258_v40, %v256_v38  ;;  %v267_v43 = vadd.f32 %v259_v41, %v257_v39 }
  0xcf   : > { %v261_v44 = vrot.slane %v260_v42, 4  ;;  %v268_v45 = vrot.slane %v267_v43, 4 }
  0xd1   : > { %v262_v46 = vadd.f32 %v261_v44, %v260_v42  ;;  %v269_v47 = vadd.f32 %v268_v45, %v267_v43 }
  0xd3   : > { %v263_v48 = vrot.slane %v262_v46, 2  ;;  %v270_v49 = vrot.slane %v269_v47, 2 }
  0xd5   : > { %v264_v50 = vadd.f32 %v263_v48, %v262_v46  ;;  %v271_v52 = vadd.f32 %v270_v49, %v269_v47 }
  0xd7   : > { %v265_v53 = vrot.slane %v264_v50, 1  ;;  %v272_v54 = vrot.slane %v271_v52, 1 }
  0xd9   : > { %v266_v55 = vadd.f32 %v265_v53, %v264_v50  ;;  %v273_v56 = vadd.f32 %v272_v54, %v271_v52 }
  0xdb   : > { %v302_v57 = vcombine.low %v266_v55, %v273_v56 }
  0xdd   : > { %v309_v58 = vrot.slane %v302_v57, %v917_v37 }
  0xdf   : > { %v316_v60 = vrot.slane %v309_v58, %v917_v37 }
  0xe1   : > { %v318_v61 = vadd.f32 %v316_v60, %v299_v59 }
  0xe3   : > { %319 = vst.msk [vmem:[#allocation3] sm:$0x3] %vm926_vm2, %v318_v61 }
  0xe4 PF: > { %p611_p3 = scmp.ne.s32.totalorder %s804_s10, 2 }
  0xe5   : > { %s772_s15 = smov (!%p611_p3), 1   ;;  %v348_v62 = vrot.slane (!%p611_p3), %v874_v0, 7  ;;  %v349_v63 = vrot.slane (!%p611_p3), %v876_v1, 7  ;;  %v350_v4 = vrot.slane (!%p611_p3), %v878_v2, 7  ;;  %v351_v5 = vrot.slane (!%p611_p3), %v880_v3, 7 }
  0xe6   : > { %342 = sbr.rel (%p611_p3) target bundleno = 600 (0x258), region = 40  ;;  %357 = vrot.lane.b32.xlu0 (!%p611_p3), %v874_v0, %s772_s15  ;;  %vm352_vm4 = vcmp.lt.s32.totalorder (!%p611_p3), %v886_v15, 1  ;;  %vm380_vm5 = vcmp.ge.s32.totalorder (!%p611_p3), %v886_v15, 1  ;;  %v773_v16 = vmov (!%p611_p3), 1966171168   ;;  %vm964_vm6 = vcmp.lt.s32.totalorder (!%p611_p3), %v172_v14, 256 }
  0xe7   : > { %v355_v37 = vsel (!%p611_p3), %vm352_vm4, %v350_v4, %v348_v62  ;;  %v356_v51 = vsel (!%p611_p3), %vm352_vm4, %v351_v5, %v349_v63  ;;  %v435_v19 = vunpack.c.l.s4 (!%p611_p3), %v773_v16  ;;  %v430_v36 = vld [vmem:[#allocation2] sm:$0x3] (!%p611_p3)  ;;  %vm505_vm7 = vcmask (!%p611_p3), 1040384  }
  0xe8   : > { %v372_v6 = vsub.f32 (!%p611_p3), %v874_v0, %v355_v37  ;;  %v373_v7 = vsub.f32 (!%p611_p3), %v876_v1, %v356_v51  ;;  %v366_v44 = vand.u32 (!%p611_p3), 127, %v172_v14  ;;  %vm536_vm10 = vcmask (!%p611_p3), 0  }
  0xe9   : > { %v436_v26 = vunpack.c.0.s8 (!%p611_p3), %v435_v19 }
  0xea   : > { %361 = vrot.lane.b32.xlu0 (!%p611_p3), %v876_v1, %s772_s15  ;;  %v384_v8 = vmul.f32 (!%p611_p3), %v372_v6, %v372_v6  ;;  %v385_v9 = vmul.f32 (!%p611_p3), %v373_v7, %v373_v7  ;;  %vm367_vm8 = vcmp.lt.s32.totalorder (!%p611_p3), %v366_v44, 1  ;;  %v455_v51 = vld [vmem:[#allocation3] sm:$0x3] (!%p611_p3)  ;;  %vm477_vm9 = vcmp.ge.s32.totalorder (!%p611_p3), %v366_v44, 1 }
  0xeb   : > { %v439_v31 = vsub.s32 (!%p611_p3), %v436_v26, %v886_v15 }
  0xec   : > { %v388_v10 = vsel (!%p611_p3), %vm380_vm5, %v384_v8, 0.0  ;;  %v389_v11 = vsel (!%p611_p3), %vm380_vm5, %v385_v9, 0.0 }
  0xed   : > { %v401_v12 = vrot.slane %v388_v10, 4  ;;  %v408_v2 = vrot.slane %v389_v11, 4 }
  0xef   : > { %v402_v13 = vadd.f32 %v401_v12, %v388_v10  ;;  %v409_v3 = vadd.f32 %v408_v2, %v389_v11 }
  0xf1   : > { %v403_v20 = vrot.slane %v402_v13, 2  ;;  %v410_v21 = vrot.slane %v409_v3, 2 }
  0xf3   : > { %v404_v22 = vadd.f32 %v403_v20, %v402_v13  ;;  %v411_v25 = vadd.f32 %v410_v21, %v409_v3 }
  0xf5   : > { %v405_v27 = vrot.slane %v404_v22, 1  ;;  %v412_v28 = vrot.slane %v411_v25, 1 }
  0xf7   : > { %v406_v29 = vadd.f32 %v405_v27, %v404_v22  ;;  %v413_v30 = vadd.f32 %v412_v28, %v411_v25 }
  0xf9   : > { %v414_v32 = vadd.f32 %v406_v29, %v898_v23  ;;  %v415_v33 = vadd.f32 %v413_v30, %v900_v24 }
  0xfb   : > { %v433_v34 = vcombine.low %v414_v32, %v415_v33 }
  0xfd   : > { %v440_v35 = vrot.slane %v433_v34, %v439_v31 }
  0xff   : > { %v447_v38 = vrot.slane %v440_v35, %v439_v31 }
 0x101   : > { %v449_v40 = vadd.f32 %v447_v38, %v430_v36 }
 0x103   : > { %454 = vst.msk [vmem:[#allocation2] sm:$0x3] %vm964_vm6, %v449_v40 }
 0x10a   : > { %v493_v41 = vld [vmem:[#allocation2] sm:$0x3] }
 0x10b   : > { %v498_v15 = vrot.slane %v493_v41, %v889_v17  ;;  %v502_v23 = vrot.slane %v493_v41, %v892_v18 }
 0x10d   : > { %v506_v24 = vsel %vm505_vm7, %v498_v15, 0.0  ;;  %v507_v42 = vsel %vm505_vm7, %v502_v23, 0.0 }
 0x10e   : > { %v508_v43 = vadd.f32 %v507_v42, %v506_v24 }
 0x110   : > { %509 = vadd.xlane.f32.xlu1 %v508_v43 }
 0x158   : > { %v358_v45 = vpop.permute.xlu0 %357 }
 0x15c   : > { %v362_v46 = vpop.permute.xlu0 %361 }
 0x15d   : > { %v368_v47 = vsel %vm367_vm8, %v358_v45, %v362_v46  ;;  %v370_v48 = vsel %vm367_vm8, %v362_v46, %v358_v45 }
 0x15e   : > { %v376_v49 = vsub.f32 %v874_v0, %v370_v48  ;;  %v377_v50 = vsub.f32 %v876_v1, %v368_v47 }
 0x160   : > { %v392_v52 = vmul.f32 %v376_v49, %v376_v49  ;;  %v393_v53 = vmul.f32 %v377_v50, %v377_v50 }
 0x162   : > { %v417_v54 = vrot.slane %v392_v52, 4  ;;  %v424_v55 = vrot.slane %v393_v53, 4 }
 0x164   : > { %v418_v56 = vadd.f32 %v417_v54, %v392_v52  ;;  %v425_v57 = vadd.f32 %v424_v55, %v393_v53 }
 0x166   : > { %v419_v58 = vrot.slane %v418_v56, 2  ;;  %v426_v59 = vrot.slane %v425_v57, 2 }
 0x168   : > { %v420_v60 = vadd.f32 %v419_v58, %v418_v56  ;;  %v427_v61 = vadd.f32 %v426_v59, %v425_v57 }
 0x16a   : > { %v421_v14 = vrot.slane %v420_v60, 1  ;;  %v428_v62 = vrot.slane %v427_v61, 1 }
 0x16c   : > { %v422_v63 = vadd.f32 %v421_v14, %v420_v60  ;;  %v429_v4 = vadd.f32 %v428_v62, %v427_v61 }
 0x16e   : > { %v458_v5 = vcombine.low %v422_v63, %v429_v4 }
 0x170   : > { %v465_v37 = vrot.slane %v458_v5, %v439_v31 }
 0x172   : > { %v472_v0 = vrot.slane %v465_v37, %v439_v31 }
 0x174   : > { %v474_v6 = vadd.f32 %v472_v0, %v455_v51 }
 0x176   : > { %475 = vst.msk [vmem:[#allocation3] sm:$0x3] %vm964_vm6, %v474_v6 }
 0x17d   : > { %v479_v1 = vld [vmem:[#allocation3] sm:$0x3] }
 0x17e   : > { %v484_v7 = vrot.slane %v479_v1, %v889_v17  ;;  %v488_v8 = vrot.slane %v479_v1, %v892_v18 }
 0x180   : > { %v491_v9 = vsel %vm477_vm9, %v484_v7, 0.0  ;;  %v520_v10 = vsel %vm505_vm7, %v488_v8, 0.0 }
 0x181   : > { %v519_v11 = vsel %vm505_vm7, %v491_v9, 0.0 }
 0x182   : > { %v521_v12 = vadd.f32 %v520_v10, %v519_v11 }
 0x184   : > { %522 = vadd.xlane.f32.xlu1 %v521_v12 }
 0x19d   : > { %v510_v2 = vpop.xlane.xlu1 %509 }
 0x19e   : > { %v511_v13 = vrot.slane %v510_v2, 4 }
 0x1a0   : > { %v512_v3 = vadd.f32 %v511_v13, %v510_v2 }
 0x1a2   : > { %v513_v16 = vrot.slane %v512_v3, 2 }
 0x1a4   : > { %v514_v19 = vadd.f32 %v513_v16, %v512_v3 }
 0x1a6   : > { %v515_v20 = vrot.slane %v514_v19, 1 }
 0x1a8   : > { %v516_v21 = vadd.f32 %v515_v20, %v514_v19 }
 0x1aa   : > { %619 = vpush %v516_v21 }
 0x1db   : > { %s620_s20 = spop %619 }
 0x1dc   : > { %v518_v29 = vstv %s620_s20 }
 0x1dd   : > { %v532_v31 = vmul.f32 0.00010016026, %v518_v29 }
 0x211   : > { %v523_v22 = vpop.xlane.xlu1 %522 }
 0x212   : > { %v524_v25 = vrot.slane %v523_v22, 4 }
 0x214   : > { %v525_v17 = vadd.f32 %v524_v25, %v523_v22 }
 0x216   : > { %v526_v26 = vrot.slane %v525_v17, 2 }
 0x218   : > { %v527_v18 = vadd.f32 %v526_v26, %v525_v17 }
 0x21a   : > { %v528_v27 = vrot.slane %v527_v18, 1 }
 0x21c   : > { %v529_v28 = vadd.f32 %v528_v27, %v527_v18 }
 0x21e   : > { %621 = vpush %v529_v28 }
 0x24f   : > { %s622_s22 = spop %621 }
 0x250   : > { %v531_v30 = vstv %s622_s22 }
 0x251   : > { %v533_v32 = vmul.f32 9.8039214e-05, %v531_v30 }
 0x253   : > { %v534_v33 = vadd.f32 %v533_v32, %v532_v31 }
 0x255   : > { %v535_v34 = vmul.f32 2.0, %v534_v33 }
 0x257   : > { %537 = vst.msk [vmem:[#allocation8] sm:$0x1] %vm536_vm10, %v535_v34 }
 0x258 PF: > { %s774_s25 = smov [#allocation8]  }
 0x259   : > { %s545_s26 = sshll.u32 %s774_s25, 4  ;;  %s546_s26 = int_to_ptr.vmem [resolvable:$true] %s545_s26 }
 0x25a   : > { %s699_s27 = scalar_lea.vmem %s546_s26, 16  ;;  %s705_s28 = scalar_lea.vmem %s546_s26, 32 }
 0x25b   : > { %p700_p4 = scmp.ne.s32.totalorder %s546_s26, %s699_s27  ;;  %p706_p8 = scmp.lt.s32.totalorder %s546_s26, %s546_s26 }
 0x25c   : > { %p707_p10 = scmp.lt.s32.totalorder %s705_s28, %s699_s27 }
 0x25d   : > { %p701_p5 = pnand %p700_p4, %p610_p6 }
 0x25e   : > { %p708_p11 = por %p707_p10, %p706_p8 }
 0x25f   : > { %p702_p7 = pneg %p701_p5 }
 0x261   : > { %p709_p13 = pnand %p708_p11, %p702_p7 }
 0x263   : > { %712 = shalt.err (!%p709_p13)
}
 0x264   : > { %s713_s2 = scalar_lea.hbm %s1019_s1, 16 }
 0x265   : > { %p714_p0 = scmp.ne.s32.totalorder %s1019_s1, %s713_s2  ;;  %p719_p2 = scmp.lt.u32.totalorder %s713_s2, %s1019_s1 }
 0x267   : > { %p715_p12 = pnand %p714_p0, %p610_p6 }
 0x269   : > { %p716_p1 = pneg %p715_p12 }
 0x26b   : > { %p721_p9 = pnand %p719_p2, %p716_p1 }
 0x26d   : > { %724 = shalt.err (!%p721_p9)
}
 0x26e   : > { %625 = dma.vmem_to_hbm [thread:$0]  (%p610_p6), %s546_s26, 16, %s1019_s1, [#allocation7]  }
 0x26f   : > { %746 = dma.done.wait (%p610_p6), [#allocation7], 16  }
 0x270   : > { %748 = vsyncadd (%p610_p6), [#allocation7], 4294967280 }
 0x271 PF: > { %p12_p3 = scmp.ge.s32.totalorder %s807_s11, 5   ;;  %s1025_s6 = smov %s755_s7 }
 0x272   : > { %s1026_s7 = smov %s759_s8  ;;  %s1027_s8 = smov %s817_s14 }
 0x273   : > { %s1028_s9 = smov %s807_s11  ;;  %14 = sbr.rel (!%p12_p3) target bundleno = 4 (0x4), region = 73 }
 0x27a   :  { %558 = vsyncpa [#allocation6], 1 }
 0x27b   :  { %560 = vsyncpa [#allocation6 + $0x1], 1 }
 0x27c   :  { %561 = vsyncpa [#allocation7], 1 }
 0x27d   :  { %563 = vsyncpa [#allocation7 + $0x1], 1 }

</bundles_post_ra>
